<compile_context>
chip_gen: v6e
topology: v6e:2x2x1
jax: 0.10.0
libtpu: 0.0.40
codegen_flags: <defaults>
</compile_context>

<pallas_src>
import functools

import jax
import jax.numpy as jnp
from jax.experimental import pallas as pl
from jax.experimental.pallas import tpu as pltpu


# --------------------------------------------------------------------------- #
# tile-sizing policy                                                           #
# --------------------------------------------------------------------------- #

_TILE_TARGET_BYTES = 3 << 20     # ~3 MiB HBM input tile: 85-86% of roofline regime
_VMEM_BUDGET_BYTES = 24 << 20    # 2x(in+out) double-buffers + f32 temps; fits v7x 64 MiB/TC
_MIN_SPLIT_BYTES = 512 << 10     # only split into >=2 grid steps (v7x megacore) above this
_F32_TEMPS = 3                   # x(f32), xc, result-before-cast


def _itemsize(dtype):
    return jnp.dtype(dtype).itemsize


def _row_align(dtype):
    # Sub-32-bit dtypes pack 16 / 32 rows per sublane group.
    return {4: 8, 2: 16, 1: 32}.get(_itemsize(dtype), 8)


def _per_elem_vmem_bytes(itemsize):
    # 2x double-buffered input + 2x double-buffered output + ~3 f32 temporaries.
    return 4 * itemsize + 4 * _F32_TEMPS


def _vmem_limit_bytes(tile_elems, itemsize):
    footprint = tile_elems * _per_elem_vmem_bytes(itemsize)
    limit = int(footprint * 1.5) + (4 << 20)
    # Clamp: never below a comfortable floor, never above what v7x (64 MiB/TC
    # physical) can take.
    return int(max(16 << 20, min(48 << 20, limit)))


def _align_up(n, a):
    return -(-n // a) * a


# --------------------------------------------------------------------------- #
# channels_last: normalize over the last (lane) axis of a (rows, C) view       #
# --------------------------------------------------------------------------- #

def _ln_rows_kernel(x_ref, w_ref, b_ref, o_ref, *, eps):
    # x_ref: (block_rows, C); w_ref, b_ref: (1, C)
    x = x_ref[...].astype(jnp.float32)
    mean = jnp.mean(x, axis=-1, keepdims=True)
    xc = x - mean
    var = jnp.mean(xc * xc, axis=-1, keepdims=True)
    inv = jax.lax.rsqrt(var + eps)
    w = w_ref[...].astype(jnp.float32)
    b = b_ref[...].astype(jnp.float32)
    o_ref[...] = (xc * inv * w + b).astype(o_ref.dtype)


def _pick_block_rows(n, c, dtype,
                     target_bytes=_TILE_TARGET_BYTES,
                     vmem_budget=_VMEM_BUDGET_BYTES):
    itemsize = _itemsize(dtype)
    align = _row_align(dtype)
    per_row_hbm = c * itemsize
    per_row_vmem = c * _per_elem_vmem_bytes(itemsize)

    rows = target_bytes // per_row_hbm                      # HBM-tile target
    rows = min(rows, max(1, vmem_budget // per_row_vmem))   # VMEM footprint cap
    rows = max(align, (rows // align) * align)

    if rows >= n:
        # Keep >=2 grid steps so a v7x megacore can shard the "parallel" axis,
        # but only when each half is still a worthwhile tile.
        if n > align and n * per_row_hbm >= _MIN_SPLIT_BYTES:
            half = _align_up((n + 1) // 2, align)
            rows = half if half < n else n
        else:
            rows = n
    return int(rows)


def _ln_rows(x2d, weight, bias, eps, block_rows=None):
    """LayerNorm over the last dim of a 2-D (rows, C) array via pallas_call."""
    n, c = x2d.shape
    if block_rows is None:
        block_rows = _pick_block_rows(n, c, x2d.dtype)
    block_rows = int(min(block_rows, n))

    w2 = weight.reshape(1, c)
    b2 = bias.reshape(1, c)

    # TODO(synk): for C not a multiple of 128 (ConvNeXt C=96/192) the output tile
    # ends in masked partial stores; if the single vst slot ever shows up as the
    # limiter in the bundle dump, route small-C cases through a sublane-reduce
    # layout like the channels_first kernel.
    grid = (pl.cdiv(n, block_rows),)   # ragged last block -> masked partial stores
    return pl.pallas_call(
        functools.partial(_ln_rows_kernel, eps=float(eps)),
        out_shape=jax.ShapeDtypeStruct((n, c), x2d.dtype),
        grid_spec=pltpu.PrefetchScalarGridSpec(
            num_scalar_prefetch=0,
            grid=grid,
            in_specs=[
                pl.BlockSpec((block_rows, c), lambda i: (i, 0)),
                pl.BlockSpec((1, c), lambda i: (0, 0)),
                pl.BlockSpec((1, c), lambda i: (0, 0)),
            ],
            out_specs=pl.BlockSpec((block_rows, c), lambda i: (i, 0)),
        ),
        compiler_params=pltpu.CompilerParams(
            dimension_semantics=("parallel",),
            vmem_limit_bytes=_vmem_limit_bytes(block_rows * c, _itemsize(x2d.dtype)),
        ),
    )(x2d, w2, b2)


def layer_norm_channels_last(x, weight, bias, eps=1e-6, block_rows=None):
    """x: (..., C), normalized over C — matches F.layer_norm(x, (C,), w, b, eps)."""
    c = x.shape[-1]
    x2 = x.reshape(-1, c)
    y2 = _ln_rows(x2, weight, bias, eps, block_rows=block_rows)
    return y2.reshape(x.shape)


# --------------------------------------------------------------------------- #
# channels_first: normalize over C directly on the (B, C, H*W) layout          #
# (no HBM transposes; C on the sublane axis, H*W lane-dense)                   #
# --------------------------------------------------------------------------- #

def _ln_cf_kernel(x_ref, w_ref, b_ref, o_ref, *, eps):
    # x_ref: (bt, C, tile_hw); w_ref, b_ref: (1, C, 1). Reduce over the C
    # (sublane) axis -> XLU; lane axis stays H*W-dense.
    x = x_ref[...].astype(jnp.float32)
    mean = jnp.mean(x, axis=1, keepdims=True)
    xc = x - mean
    var = jnp.mean(xc * xc, axis=1, keepdims=True)
    inv = jax.lax.rsqrt(var + eps)
    w = w_ref[...].astype(jnp.float32)
    b = b_ref[...].astype(jnp.float32)
    o_ref[...] = (xc * inv * w + b).astype(o_ref.dtype)


def _pick_tile_hw(hw, c, dtype,
                  target_bytes=_TILE_TARGET_BYTES,
                  vmem_budget=_VMEM_BUDGET_BYTES):
    itemsize = _itemsize(dtype)
    per_lane_hbm = c * itemsize
    per_lane_vmem = c * _per_elem_vmem_bytes(itemsize)

    t = target_bytes // per_lane_hbm
    t = min(t, max(1, vmem_budget // per_lane_vmem))
    t = max(128, (t // 128) * 128)

    if t >= hw:
        if hw > 128 and hw * per_lane_hbm >= _MIN_SPLIT_BYTES:
            half = _align_up((hw + 1) // 2, 128)
            t = half if half < hw else hw
        else:
            t = hw
    return int(t)


def layer_norm_channels_first(x, weight, bias, eps=1e-6, batch_block=None, tile_hw=None):
    """x: (B, C, H, W) NCHW, normalized over C — matches the PyTorch channels_first path."""
    b_, c, h, w_ = x.shape
    hw = h * w_
    x3 = x.reshape(b_, c, hw)                         # contiguous reshape, no transpose
    itemsize = _itemsize(x.dtype)

    if tile_hw is None and batch_block is None:
        per_img_hbm = c * hw * itemsize
        per_img_vmem = c * hw * _per_elem_vmem_bytes(itemsize)
        if per_img_hbm <= _TILE_TARGET_BYTES:
            # Small spatial extent (late ConvNeXt stages: 7x7 / 14x14): batch the
            # block over B so one grid step moves a ~TILE_TARGET-sized slab
            # instead of many tiny DMAs with narrow masked stores.  (C, hw) are
            # the full extents, so this is always a legal BlockSpec.
            tile_hw = hw
            bt = min(_TILE_TARGET_BYTES // per_img_hbm,
                     max(1, _VMEM_BUDGET_BYTES // per_img_vmem))
            bt = int(max(1, min(bt, b_)))
            if bt >= b_ and b_ > 1 and b_ * per_img_hbm >= _MIN_SPLIT_BYTES:
                bt = (b_ + 1) // 2                     # >=2 grid steps for v7x megacore
            batch_block = bt
        else:
            batch_block = 1
            tile_hw = _pick_tile_hw(hw, c, x.dtype)
    if batch_block is None:
        batch_block = 1
    if tile_hw is None:
        tile_hw = hw
    batch_block = int(min(batch_block, b_))
    tile_hw = int(min(tile_hw, hw))

    wv = weight.reshape(1, c, 1)
    bv = bias.reshape(1, c, 1)

    grid = (pl.cdiv(b_, batch_block), pl.cdiv(hw, tile_hw))   # ragged tails are masked
    y3 = pl.pallas_call(
        functools.partial(_ln_cf_kernel, eps=float(eps)),
        out_shape=jax.ShapeDtypeStruct((b_, c, hw), x.dtype),
        grid_spec=pltpu.PrefetchScalarGridSpec(
            num_scalar_prefetch=0,
            grid=grid,
            in_specs=[
                pl.BlockSpec((batch_block, c, tile_hw), lambda i, j: (i, 0, j)),
                pl.BlockSpec((1, c, 1), lambda i, j: (0, 0, 0)),
                pl.BlockSpec((1, c, 1), lambda i, j: (0, 0, 0)),
            ],
            out_specs=pl.BlockSpec((batch_block, c, tile_hw), lambda i, j: (i, 0, j)),
        ),
        compiler_params=pltpu.CompilerParams(
            dimension_semantics=("parallel", "parallel"),
            vmem_limit_bytes=_vmem_limit_bytes(batch_block * c * tile_hw, itemsize),
        ),
    )(x3, wv, bv)
    return y3.reshape(b_, c, h, w_)


# --------------------------------------------------------------------------- #
# references & self-test                                                       #
# --------------------------------------------------------------------------- #

def _reference_ln_last(x, weight, bias, eps):
    xf = x.astype(jnp.float32)
    mean = jnp.mean(xf, axis=-1, keepdims=True)
    var = jnp.mean((xf - mean) ** 2, axis=-1, keepdims=True)
    return ((xf - mean) / jnp.sqrt(var + eps)) * weight + bias


def _reference_ln_cf(x, weight, bias, eps):
    xf = x.astype(jnp.float32)
    mean = jnp.mean(xf, axis=1, keepdims=True)
    var = jnp.mean((xf - mean) ** 2, axis=1, keepdims=True)
    xn = (xf - mean) / jnp.sqrt(var + eps)
    return weight[None, :, None, None] * xn + bias[None, :, None, None]


if __name__ == "__main__":
    key = jax.random.PRNGKey(0)
    eps = 1e-6
    k1, k2, k3, k4, k5 = jax.random.split(key, 5)

    # ---- channels_first: NCHW input (ConvNeXt downsample / block LN path)
    B, C, H, W = 2, 4, 16, 16
    x_cf = jax.random.normal(k1, (B, C, H, W), dtype=jnp.float32)
    weight_cf = jnp.ones((C,), jnp.float32) + 0.1 * jnp.arange(C, dtype=jnp.float32)
    bias_cf = 0.01 * jnp.arange(C, dtype=jnp.float32)

    y_cf = jax.block_until_ready(layer_norm_channels_first(x_cf, weight_cf, bias_cf, eps))
    ref_cf = _reference_ln_cf(x_cf, weight_cf, bias_cf, eps)
    assert jnp.allclose(y_cf, ref_cf, atol=1e-5, rtol=1e-5)

    # ---- channels_last: NHWC input
    Bl, Hl, Wl, Cl = 2, 8, 8, 32
    x_cl = jax.random.normal(k2, (Bl, Hl, Wl, Cl), dtype=jnp.float32)
    weight_cl = jnp.ones((Cl,), jnp.float32) - 0.05 * jnp.arange(Cl, dtype=jnp.float32) / Cl
    bias_cl = 0.02 * jnp.arange(Cl, dtype=jnp.float32)

    y_cl = jax.block_until_ready(layer_norm_channels_last(x_cl, weight_cl, bias_cl, eps))
    ref_cl = _reference_ln_last(x_cl, weight_cl, bias_cl, eps)
    assert jnp.allclose(y_cl, ref_cl, atol=1e-5, rtol=1e-5)

    # ---- ragged-grid coverage: row count not a multiple of block_rows
    x_rg = jax.random.normal(k3, (2, 5, 5, 32), dtype=jnp.float32)   # 50 rows, block 16
    y_rg = jax.block_until_ready(
        layer_norm_channels_last(x_rg, weight_cl, bias_cl, eps, block_rows=16))
    ref_rg = _reference_ln_last(x_rg, weight_cl, bias_cl, eps)
    assert jnp.allclose(y_rg, ref_rg, atol=1e-5, rtol=1e-5)

    # ---- ragged-grid coverage: H*W not a multiple of tile_hw (channels_first)
    x_rg2 = jax.random.normal(k4, (1, 4, 18, 18), dtype=jnp.float32)  # hw=324, tile 128
    y_rg2 = jax.block_until_ready(
        layer_norm_channels_first(x_rg2, weight_cf, bias_cf, eps, tile_hw=128))
    ref_rg2 = _reference_ln_cf(x_rg2, weight_cf, bias_cf, eps)
    assert jnp.allclose(y_rg2, ref_rg2, atol=1e-5, rtol=1e-5)

    # ---- small-spatial channels_first with batch-blocked tiles + ragged batch tail
    Bs, Cs, Hs, Ws = 3, 8, 4, 4
    x_bb = jax.random.normal(k5, (Bs, Cs, Hs, Ws), dtype=jnp.float32)
    weight_bb = jnp.ones((Cs,), jnp.float32) + 0.05 * jnp.arange(Cs, dtype=jnp.float32)
    bias_bb = 0.03 * jnp.arange(Cs, dtype=jnp.float32)
    y_bb = jax.block_until_ready(
        layer_norm_channels_first(x_bb, weight_bb, bias_bb, eps, batch_block=2))
    ref_bb = _reference_ln_cf(x_bb, weight_bb, bias_bb, eps)
    assert jnp.allclose(y_bb, ref_bb, atol=1e-5, rtol=1e-5)

    print("KERNEL_OK")
</pallas_src>

<mosaic_0001>
module attributes {stable_mosaic.version = 11 : i64} {
  func.func @_ln_cf_kernel(%arg0: i32, %arg1: i32, %arg2: memref<2x4x256xf32, #tpu.memory_space<vmem>>, %arg3: memref<1x4x1xf32, #tpu.memory_space<vmem>>, %arg4: memref<1x4x1xf32, #tpu.memory_space<vmem>>, %arg5: memref<2x4x256xf32, #tpu.memory_space<vmem>>) attributes {dimension_semantics = [#tpu.dimension_semantics<parallel>, #tpu.dimension_semantics<parallel>], iteration_bounds = array<i64: 1, 1>, scalar_prefetch = 0 : i64, scratch_operands = 0 : i64, tpu.core_type = #tpu.core_type<tc>, window_params = [{transform_indices = @transform_0, window_bounds = array<i64: 2, 4, 256>}, {pipeline_mode = #tpu.pipeline_mode<synchronous>, transform_indices = @transform_1, window_bounds = array<i64: 1, 4, 1>}, {pipeline_mode = #tpu.pipeline_mode<synchronous>, transform_indices = @transform_2, window_bounds = array<i64: 1, 4, 1>}, {transform_indices = @transform_3, window_bounds = array<i64: 2, 4, 256>}]} {
    %c0 = arith.constant 0 : index
    %c0_0 = arith.constant 0 : index
    %c0_1 = arith.constant 0 : index
    %0 = vector.load %arg2[%c0, %c0_0, %c0_1] : memref<2x4x256xf32, #tpu.memory_space<vmem>>, vector<2x4x256xf32>
    %cst = arith.constant dense<0.000000e+00> : vector<2x256xf32>
    %1 = vector.multi_reduction <add>, %0, %cst [1] : vector<2x4x256xf32> to vector<2x256xf32>
    %2 = vector.shape_cast %1 : vector<2x256xf32> to vector<2x1x256xf32>
    %cst_2 = arith.constant 4.000000e+00 : f32
    %3 = vector.broadcast %cst_2 : f32 to vector<2x1x256xf32>
    %4 = arith.divf %2, %3 : vector<2x1x256xf32>
    %5 = vector.broadcast %4 : vector<2x1x256xf32> to vector<2x4x256xf32>
    %6 = arith.subf %0, %5 : vector<2x4x256xf32>
    %7 = arith.mulf %6, %6 : vector<2x4x256xf32>
    %cst_3 = arith.constant dense<0.000000e+00> : vector<2x256xf32>
    %8 = vector.multi_reduction <add>, %7, %cst_3 [1] : vector<2x4x256xf32> to vector<2x256xf32>
    %9 = vector.shape_cast %8 : vector<2x256xf32> to vector<2x1x256xf32>
    %cst_4 = arith.constant 4.000000e+00 : f32
    %10 = vector.broadcast %cst_4 : f32 to vector<2x1x256xf32>
    %11 = arith.divf %9, %10 : vector<2x1x256xf32>
    %cst_5 = arith.constant 9.99999997E-7 : f32
    %12 = vector.broadcast %cst_5 : f32 to vector<2x1x256xf32>
    %13 = arith.addf %11, %12 : vector<2x1x256xf32>
    %14 = math.rsqrt %13 : vector<2x1x256xf32>
    %c0_6 = arith.constant 0 : index
    %c0_7 = arith.constant 0 : index
    %c0_8 = arith.constant 0 : index
    %15 = vector.load %arg3[%c0_6, %c0_7, %c0_8] : memref<1x4x1xf32, #tpu.memory_space<vmem>>, vector<1x4x1xf32>
    %c0_9 = arith.constant 0 : index
    %c0_10 = arith.constant 0 : index
    %c0_11 = arith.constant 0 : index
    %16 = vector.load %arg4[%c0_9, %c0_10, %c0_11] : memref<1x4x1xf32, #tpu.memory_space<vmem>>, vector<1x4x1xf32>
    %17 = vector.broadcast %14 : vector<2x1x256xf32> to vector<2x4x256xf32>
    %18 = arith.mulf %6, %17 : vector<2x4x256xf32>
    %19 = vector.broadcast %15 : vector<1x4x1xf32> to vector<2x4x256xf32>
    %20 = arith.mulf %18, %19 : vector<2x4x256xf32>
    %21 = vector.broadcast %16 : vector<1x4x1xf32> to vector<2x4x256xf32>
    %22 = arith.addf %20, %21 : vector<2x4x256xf32>
    %c0_12 = arith.constant 0 : index
    %c0_13 = arith.constant 0 : index
    %c0_14 = arith.constant 0 : index
    %23 = vector.load %arg5[%c0_12, %c0_13, %c0_14] : memref<2x4x256xf32, #tpu.memory_space<vmem>>, vector<2x4x256xf32>
    tpu.vector_store %arg5[%c0_12, %c0_13, %c0_14], %22 {strides = array<i32>} : memref<2x4x256xf32, #tpu.memory_space<vmem>>, vector<2x4x256xf32>,
    return
  }
  func.func @transform_0(%arg0: i32, %arg1: i32) -> (i32, i32, i32) {
    %c0_i32 = arith.constant 0 : i32
    %c0_i32_0 = arith.constant 0 : i32
    return %arg0, %c0_i32, %arg1 : i32, i32, i32
  }
  func.func @transform_1(%arg0: i32, %arg1: i32) -> (i32, i32, i32) {
    %c0_i32 = arith.constant 0 : i32
    %c0_i32_0 = arith.constant 0 : i32
    %c0_i32_1 = arith.constant 0 : i32
    %c0_i32_2 = arith.constant 0 : i32
    return %c0_i32, %c0_i32_0, %c0_i32_1 : i32, i32, i32
  }
  func.func @transform_2(%arg0: i32, %arg1: i32) -> (i32, i32, i32) {
    %c0_i32 = arith.constant 0 : i32
    %c0_i32_0 = arith.constant 0 : i32
    %c0_i32_1 = arith.constant 0 : i32
    %c0_i32_2 = arith.constant 0 : i32
    return %c0_i32, %c0_i32_0, %c0_i32_1 : i32, i32, i32
  }
  func.func @transform_3(%arg0: i32, %arg1: i32) -> (i32, i32, i32) {
    %c0_i32 = arith.constant 0 : i32
    %c0_i32_0 = arith.constant 0 : i32
    return %arg0, %c0_i32, %arg1 : i32, i32, i32
  }
}

</mosaic_0001>

<bundles_post_ra>
// kernel: tpu_custom_call.1
= control target key start
LH: loop header
LB: loop body
LE: loop exit
PB: predicated region body
PF: predicated region fallthrough
CT: control target
= control target key end

     0   :  { %8 = vsyncpa [#allocation3], 0  ;;  %s301_s0 = inlined_call_operand.hbm [shape: f32[2,4,256], index: 0, kind: input, shape index: {}]   ;;  %s302_s1 = inlined_call_operand.vmem [shape: f32[1,4,1], index: 1, kind: input, shape index: {}]   ;;  %s303_s2 = inlined_call_operand.vmem [shape: f32[1,4,1], index: 2, kind: input, shape index: {}]   ;;  %s304_s3 = inlined_call_operand.hbm [shape: f32[2,4,256], index: 3, kind: output, shape index: {}]  }
   0x1   :  { %9 = vsyncpa [#allocation4], 0  ;;  %s249_s12 = smov [#allocation2]  }
   0x2   :  { %s15_s13 = sshll.u32 %s249_s12, 4  ;;  %s16_s13 = int_to_ptr.vmem [resolvable:$true] %s15_s13 }
   0x3   :  { %s213_s14 = scalar_lea.vmem %s16_s13, 256  ;;  %p218_p1 = scmp.lt.s32.totalorder %s16_s13, %s16_s13 }
   0x4   :  { %p214_p0 = scmp.ne.s32.totalorder %s16_s13, %s213_s14  ;;  %p219_p2 = scmp.lt.s32.totalorder %s213_s14, %s213_s14 }
   0x6   :  { %p220_p3 = por %p219_p2, %p218_p1 }
   0x8   :  { %p221_p4 = pnand %p220_p3, %p214_p0 }
   0xa   :  { %224 = shalt.err (!%p221_p4)
}
   0xb   :  { %s250_s15 = smov 128   ;;  %s251_s16 = smov 8  }
   0xc   :  { %21 = dma.hbm_to_vmem [thread:$0]  %s301_s0, 256, %s16_s13, [#allocation3], %s250_s15, %s250_s15, %s251_s16  }
   0xd   :  { %245 = dma.done.wait [#allocation3], 256  }
   0xe   :  { %246 = vsyncadd [#allocation3], 4294967040  ;;  %v252_v0 = vmov 0   ;;  %v129_v1 = vld [vmem:[%s302_s1] sm:$0xf]  ;;  %v30_v4 = vld [vmem:[#allocation2 + $0x8] sm:$0xff] }
   0xf   :  { %194 = vset.pattern.permute.xlu0 %v252_v0  ;;  %v130_v2 = vld [vmem:[%s303_s2] sm:$0xf]  ;;  %vm37_vm0 = vcmask 1043456   ;;  %v34_v6 = vcombine.high %v30_v4, %v30_v4  ;;  %s254_s0 = smov [#allocation5]  }
  0x10   :  { %143 = vperm.xlu0 %194, %v129_v1   ;;  %v29_v3 = vld [vmem:[#allocation2] sm:$0xff]  ;;  %v52_v9 = vsel %vm37_vm0, %v30_v4, 0.0  ;;  %s176_s1 = sshll.u32 %s254_s0, 4  ;;  %s177_s1 = int_to_ptr.vmem [resolvable:$true] %s176_s1 }
  0x11   :  { %v33_v5 = vcombine.high %v29_v3, %v29_v3  ;;  %v38_v7 = vsel %vm37_vm0, %v29_v3, 0.0  ;;  %v59_v10 = vsel %vm37_vm0, %v34_v6, 0.0  ;;  %v53_v13 = vrot.slane %v52_v9, 4  ;;  %s225_s2 = scalar_lea.vmem %s177_s1, 256  ;;  %p230_p6 = scmp.lt.s32.totalorder %s177_s1, %s177_s1 }
  0x12   :  { %v39_v11 = vrot.slane %v38_v7, 4  ;;  %v60_v14 = vrot.slane %v59_v10, 4  ;;  %p226_p5 = scmp.ne.s32.totalorder %s177_s1, %s225_s2  ;;  %p231_p7 = scmp.lt.s32.totalorder %s225_s2, %s225_s2 }
  0x13   :  { %v45_v8 = vsel %vm37_vm0, %v33_v5, 0.0  ;;  %v54_v17 = vadd.f32 %v53_v13, %v52_v9 }
  0x14   :  { %157 = vperm.xlu0 %194, %v130_v2   ;;  %v46_v12 = vrot.slane %v45_v8, 4  ;;  %v40_v15 = vadd.f32 %v39_v11, %v38_v7  ;;  %v61_v18 = vadd.f32 %v60_v14, %v59_v10  ;;  %p232_p8 = por %p231_p7, %p230_p6 }
  0x15   :  { %v55_v21 = vrot.slane %v54_v17, 2 }
  0x16   :  { %v47_v16 = vadd.f32 %v46_v12, %v45_v8  ;;  %v41_v19 = vrot.slane %v40_v15, 2  ;;  %v62_v22 = vrot.slane %v61_v18, 2  ;;  %p233_p9 = pnand %p232_p8, %p226_p5 }
  0x17   :  { %v56_v25 = vadd.f32 %v55_v21, %v54_v17  ;;  %v148_v21 = vlaneseq }
  0x18   :  { %v48_v20 = vrot.slane %v47_v16, 2  ;;  %v42_v23 = vadd.f32 %v41_v19, %v40_v15  ;;  %v63_v26 = vadd.f32 %v62_v22, %v61_v18  ;;  %v253_v19 = vmov 839922192  }
  0x19   :  { %v57_v29 = vrot.slane %v56_v25, 1 }
  0x1a   :  { %v49_v24 = vadd.f32 %v48_v20, %v47_v16  ;;  %v43_v27 = vrot.slane %v42_v23, 1  ;;  %v64_v30 = vrot.slane %v63_v26, 1  ;;  %v146_v20 = vunpack.c.l.s4 %v253_v19 }
  0x1b   :  { %v58_v33 = vadd.f32 %v57_v29, %v56_v25 }
  0x1c   :  { %v50_v28 = vrot.slane %v49_v24, 1  ;;  %v44_v31 = vadd.f32 %v43_v27, %v42_v23  ;;  %v65_v34 = vadd.f32 %v64_v30, %v63_v26  ;;  %v147_v25 = vunpack.c.0.s8 %v146_v20 }
  0x1d   :  { %v69_v37 = vmul.f32 0.25, %v58_v33  ;;  %v149_v26 = vshrl.u32 %v148_v21, 7 }
  0x1e   :  { %v51_v32 = vadd.f32 %v50_v28, %v49_v24  ;;  %v67_v35 = vmul.f32 0.25, %v44_v31  ;;  %v70_v38 = vmul.f32 0.25, %v65_v34 }
  0x1f   :  { %v150_v28 = vsub.s32 %v147_v25, %v149_v26 }
  0x20   :  { %v68_v36 = vmul.f32 0.25, %v51_v32  ;;  %v76_v40 = vcombine.low %v69_v37, %v70_v38 }
  0x22   :  { %v75_v39 = vcombine.low %v67_v35, %v68_v36  ;;  %v80_v42 = vsub.f32 %v30_v4, %v76_v40 }
  0x24   :  { %v79_v41 = vsub.f32 %v29_v3, %v75_v39  ;;  %v82_v44 = vmul.f32 %v80_v42, %v80_v42 }
  0x26   :  { %v81_v43 = vmul.f32 %v79_v41, %v79_v41  ;;  %v86_v46 = vcombine.high %v82_v44, %v82_v44  ;;  %v103_v48 = vsel %vm37_vm0, %v82_v44, 0.0 }
  0x27   :  { %v104_v52 = vrot.slane %v103_v48, 4 }
  0x28   :  { %v85_v45 = vcombine.high %v81_v43, %v81_v43  ;;  %v89_v47 = vsel %vm37_vm0, %v81_v43, 0.0  ;;  %v110_v51 = vsel %vm37_vm0, %v86_v46, 0.0 }
  0x29   :  { %v90_v50 = vrot.slane %v89_v47, 4  ;;  %v111_v54 = vrot.slane %v110_v51, 4  ;;  %v105_v56 = vadd.f32 %v104_v52, %v103_v48 }
  0x2a   :  { %v96_v49 = vsel %vm37_vm0, %v85_v45, 0.0 }
  0x2b   :  { %v97_v53 = vrot.slane %v96_v49, 4  ;;  %v91_v55 = vadd.f32 %v90_v50, %v89_v47  ;;  %v112_v58 = vadd.f32 %v111_v54, %v110_v51  ;;  %v106_v60 = vrot.slane %v105_v56, 2 }
  0x2d   :  { %v98_v57 = vadd.f32 %v97_v53, %v96_v49  ;;  %v92_v59 = vrot.slane %v91_v55, 2  ;;  %v113_v62 = vrot.slane %v112_v58, 2  ;;  %v107_v0 = vadd.f32 %v106_v60, %v105_v56 }
  0x2f   :  { %v99_v61 = vrot.slane %v98_v57, 2  ;;  %v93_v63 = vadd.f32 %v92_v59, %v91_v55  ;;  %v114_v2 = vadd.f32 %v113_v62, %v112_v58  ;;  %v108_v4 = vrot.slane %v107_v0, 1 }
  0x31   :  { %v100_v1 = vadd.f32 %v99_v61, %v98_v57  ;;  %v94_v3 = vrot.slane %v93_v63, 1  ;;  %v115_v6 = vrot.slane %v114_v2, 1  ;;  %v109_v8 = vadd.f32 %v108_v4, %v107_v0 }
  0x33   :  { %v101_v5 = vrot.slane %v100_v1, 1  ;;  %v95_v7 = vadd.f32 %v94_v3, %v93_v63  ;;  %v116_v10 = vadd.f32 %v115_v6, %v114_v2  ;;  %v119_v12 = vmul.f32 0.25, %v109_v8 }
  0x35   :  { %v102_v9 = vadd.f32 %v101_v5, %v100_v1  ;;  %v117_v11 = vmul.f32 0.25, %v95_v7  ;;  %v120_v14 = vmul.f32 0.25, %v116_v10  ;;  %v123_v16 = vadd.f32 1e-06, %v119_v12 }
  0x37   :  { %v118_v13 = vmul.f32 0.25, %v102_v9  ;;  %v121_v15 = vadd.f32 1e-06, %v117_v11  ;;  %v124_v18 = vadd.f32 1e-06, %v120_v14 }
  0x39   :  { %v122_v17 = vadd.f32 1e-06, %v118_v13  ;;  %197 = vrsqrt.f32 %v121_v15 }
  0x3a   :  { %199 = vrsqrt.f32 %v123_v16 }
  0x3b   :  { %201 = vrsqrt.f32 %v122_v17 }
  0x3c   :  { %203 = vrsqrt.f32 %v124_v18 }
  0x46   :  { %v198_v22 = vpop.eup %197 }
  0x47   :  { %v200_v23 = vpop.eup %199 }
  0x48   :  { %v202_v24 = vpop.eup %201 }
  0x49   :  { %v204_v27 = vpop.eup %203  ;;  %v135_v29 = vcombine.low %v198_v22, %v202_v24 }
  0x4a   :  { %v136_v30 = vcombine.low %v200_v23, %v204_v27 }
  0x4b   :  { %v139_v32 = vmul.f32 %v135_v29, %v79_v41 }
  0x4c   :  { %v140_v33 = vmul.f32 %v136_v30, %v80_v42 }
  0x8b   :  { %v144_v31 = vpop.permute.xlu0 %143 }
  0x8c   :  { %v151_v34 = vrot.slane %v144_v31, %v150_v28 }
  0x8e   :  { %v153_v36 = vmul.f32 %v151_v34, %v139_v32  ;;  %v154_v37 = vmul.f32 %v151_v34, %v140_v33 }
  0x8f   :  { %v158_v35 = vpop.permute.xlu0 %157 }
  0x90   :  { %v165_v38 = vrot.slane %v158_v35, %v150_v28 }
  0x92   :  { %v167_v39 = vadd.f32 %v165_v38, %v153_v36  ;;  %v168_v40 = vadd.f32 %v165_v38, %v154_v37 }
  0x94   :  { %169 = vst [vmem:[#allocation5] sm:$0xff] %v167_v39  ;;  %170 = vst [vmem:[#allocation5 + $0x8] sm:$0xff] %v168_v40 }
  0x95   :  { %236 = shalt.err (!%p233_p9)
}
  0x96   :  { %182 = dma.vmem_to_hbm [thread:$0]  %s177_s1, 256, %s304_s3, [#allocation4], %s250_s15, %s250_s15, %s251_s16  }
  0x97   :  { %247 = dma.done.wait [#allocation4], 256  }
  0x98   :  { %248 = vsyncadd [#allocation4], 4294967040 }
  0x99   :  { %186 = vsyncpa [#allocation3], 1 }
  0x9a   :  { %187 = vsyncpa [#allocation4], 1 }

</bundles_post_ra>
